<compile_context>
chip_gen: v7x
topology: tpu7x:2x2x1
jax: 0.10.0
libtpu: 0.0.40
codegen_flags: <defaults>
</compile_context>

<pallas_src>
import jax
import jax.numpy as jnp
from jax.experimental import pallas as pl
from jax.experimental.pallas import tpu as pltpu

LANE = 128


def _round_up(x, m):
    return ((x + m - 1) // m) * m


# ----------------------------- Pallas kernel -----------------------------

def gcn_layer_kernel(a_ref, x_ref, w_ref, b_ref, out_ref, acc_ref):
    """One GCN layer: out = relu((A @ X) @ W + b), tiled over (row, node) blocks.

    a_ref  : (tm, tk)   bf16  tile of the normalized adjacency
    x_ref  : (tk, Fin)  bf16  node-feature rows of the current k block
    w_ref  : (Fin, Fo)  bf16  weight (resident, same block every step)
    b_ref  : (1, Fo)    f32   bias (resident)
    out_ref: (tm, Fo)         output row block (resident across k)
    acc_ref: (tm, Fin)  f32   VMEM accumulator for A @ X
    """
    k = pl.program_id(1)

    @pl.when(k == 0)
    def _():
        acc_ref[...] = jnp.zeros_like(acc_ref)

    # Neighborhood aggregation on the MXU, bf16 operands, f32 accumulation.
    acc_ref[...] += jnp.dot(a_ref[...], x_ref[...],
                            preferred_element_type=jnp.float32)

    @pl.when(k == pl.num_programs(1) - 1)
    def _():
        # Feature transform once per output row block: (tm,Fin) @ (Fin,Fo).
        h = jnp.dot(acc_ref[...].astype(w_ref.dtype), w_ref[...],
                    preferred_element_type=jnp.float32)
        h = h + b_ref[...]                       # bias + ReLU in f32 on the VPU
        out_ref[...] = jnp.maximum(h, 0.0).astype(out_ref.dtype)


def gcn_layer(a_norm, x, w, b, *, out_dtype, tm=128, tk=128):
    """H = relu(A_norm @ X @ W + b) via a tiled Pallas kernel.

    a_norm: (N, N) bf16, x: (N, Fin) bf16, w: (Fin, Fo) bf16, b: (1, Fo) f32.
    N, Fin, Fo must be multiples of 128 (caller pads).
    """
    n = a_norm.shape[0]
    fin = x.shape[1]
    fo = w.shape[1]
    assert n % tm == 0 and n % tk == 0, "pad N to a multiple of the tile size"

    return pl.pallas_call(
        gcn_layer_kernel,
        out_shape=jax.ShapeDtypeStruct((n, fo), out_dtype),
        grid_spec=pltpu.PrefetchScalarGridSpec(
            num_scalar_prefetch=0,
            grid=(n // tm, n // tk),
            in_specs=[
                pl.BlockSpec((tm, tk), lambda i, k: (i, k)),      # A tile
                pl.BlockSpec((tk, fin), lambda i, k: (k, 0)),     # X rows (k block)
                pl.BlockSpec((fin, fo), lambda i, k: (0, 0)),     # W (resident)
                pl.BlockSpec((1, fo), lambda i, k: (0, 0)),       # bias (resident)
            ],
            out_specs=pl.BlockSpec((tm, fo), lambda i, k: (i, 0)),
            scratch_shapes=[pltpu.VMEM((tm, fin), jnp.float32)],
        ),
        compiler_params=pltpu.CompilerParams(
            # Row-block axis is embarrassingly parallel (uses v7x's 2 TCs);
            # the node-reduction axis must stay sequential (accumulator).
            dimension_semantics=("parallel", "arbitrary"),
            # Explicit budget sized below v7x's 64 MiB physical VMEM so the
            # same tile plan scales on v5e/v6e/v7x.
            vmem_limit_bytes=48 * 1024 * 1024,
        ),
    )(a_norm, x, w, b)


@jax.jit
def encoder_forward(a_norm, x, w1, b1, w2, b2):
    """2-layer GCN encoder on padded, lane-dense operands (single jit)."""
    h1 = gcn_layer(a_norm, x, w1, b1, out_dtype=jnp.bfloat16)    # (Np, 128) bf16
    h2 = gcn_layer(a_norm, h1, w2, b2, out_dtype=jnp.float32)    # (Np, Fo_pad) f32
    return h2


# ----------------------------- JAX glue -----------------------------

def build_gcn_norm_adjacency(edge_index, num_nodes):
    """Dense A_norm matching torch_geometric GCNConv's gcn_norm:
    add self-loops, deg at targets, norm = d_src^-1/2 * d_dst^-1/2,
    messages from source aggregated at target -> A_norm[dst, src]."""
    src, dst = edge_index[0], edge_index[1]
    loops = jnp.arange(num_nodes, dtype=edge_index.dtype)
    src = jnp.concatenate([src, loops])
    dst = jnp.concatenate([dst, loops])
    w = jnp.ones(src.shape[0], dtype=jnp.float32)
    deg = jnp.zeros((num_nodes,), jnp.float32).at[dst].add(w)
    deg_inv_sqrt = jnp.where(deg > 0, 1.0 / jnp.sqrt(deg), 0.0)
    norm = deg_inv_sqrt[src] * deg_inv_sqrt[dst] * w
    return jnp.zeros((num_nodes, num_nodes), jnp.float32).at[dst, src].add(norm)


def pad2d(x, rows, cols):
    return jnp.pad(x, ((0, rows - x.shape[0]), (0, cols - x.shape[1])))


def reference_encoder_f32(a_norm, x, w1, b1, w2, b2):
    """Exact f32 module semantics."""
    h1 = jnp.maximum(a_norm @ (x @ w1) + b1[None, :], 0.0)
    h2 = jnp.maximum(a_norm @ (h1 @ w2) + b2[None, :], 0.0)
    return h2


def reference_encoder_bf16(a_norm, x, w1, b1, w2, b2):
    """Same numerics as the kernel: bf16 MXU operands, f32 accumulation."""
    bf = jnp.bfloat16
    a = a_norm.astype(bf)

    def layer(x, w, b, out_dtype):
        ax = jnp.dot(a, x.astype(bf), preferred_element_type=jnp.float32)
        h = jnp.dot(ax.astype(bf), w.astype(bf), preferred_element_type=jnp.float32)
        return jnp.maximum(h + b[None, :], 0.0).astype(out_dtype)

    h1 = layer(x, w1, b1, jnp.bfloat16)
    h2 = layer(h1, w2, b2, jnp.float32)
    return h2


# ----------------------------- Main -----------------------------

if __name__ == "__main__":
    key = jax.random.PRNGKey(0)
    k_x, k_e, k_w1, k_b1, k_w2, k_b2 = jax.random.split(key, 6)

    N, IN_DIM, HID, OUT_DIM, E = 12, 32, 128, 64, 24   # small demo shapes

    x = jax.random.normal(k_x, (N, IN_DIM), dtype=jnp.float32)
    edge_index = jax.random.randint(k_e, (2, E), 0, N, dtype=jnp.int32)

    def glorot(k, fan_in, fan_out):
        lim = jnp.sqrt(6.0 / (fan_in + fan_out))
        return jax.random.uniform(k, (fan_in, fan_out), jnp.float32, -lim, lim)

    w1 = glorot(k_w1, IN_DIM, HID)
    b1 = jax.random.uniform(k_b1, (HID,), jnp.float32, -0.1, 0.1)
    w2 = glorot(k_w2, HID, OUT_DIM)
    b2 = jax.random.uniform(k_b2, (OUT_DIM,), jnp.float32, -0.1, 0.1)

    a_norm = build_gcn_norm_adjacency(edge_index, N)

    # ---- zero-pad to lane-dense / MXU-native shapes (multiples of 128) ----
    NP = _round_up(N, LANE)            # 128
    FINP = _round_up(IN_DIM, LANE)     # 128
    OUTP = _round_up(OUT_DIM, LANE)    # 128

    a_p = pad2d(a_norm, NP, NP).astype(jnp.bfloat16)
    x_p = pad2d(x, NP, FINP).astype(jnp.bfloat16)
    w1_p = pad2d(w1, FINP, HID).astype(jnp.bfloat16)
    b1_p = b1.reshape(1, HID).astype(jnp.float32)
    w2_p = pad2d(w2, HID, OUTP).astype(jnp.bfloat16)
    b2_p = pad2d(b2.reshape(1, OUT_DIM), 1, OUTP).astype(jnp.float32)

    # Run the Pallas encoder and slice the real (N, 64) block back out.
    h2_pad = jax.block_until_ready(encoder_forward(a_p, x_p, w1_p, b1_p, w2_p, b2_p))
    h2 = h2_pad[:N, :OUT_DIM]
    assert h2.shape == (N, OUT_DIM)

    # Strict check: kernel vs a reference using the identical bf16/f32 numerics.
    ref_bf16 = jax.block_until_ready(
        reference_encoder_bf16(a_norm, x, w1, b1, w2, b2))
    assert jnp.allclose(h2, ref_bf16, atol=1e-2, rtol=1e-2), \
        "mismatch vs bf16-consistent reference"

    # Loose check: kernel vs exact f32 module semantics (bf16 operand rounding).
    ref_f32 = jax.block_until_ready(
        reference_encoder_f32(a_norm, x, w1, b1, w2, b2))
    assert jnp.allclose(h2, ref_f32, atol=1e-1, rtol=1e-1), \
        "mismatch vs f32 reference"

    print("KERNEL_OK")
</pallas_src>

<mosaic_0001>
module attributes {stable_mosaic.version = 11 : i64} {
  func.func @gcn_layer_kernel(%arg0: i32, %arg1: i32, %arg2: memref<128x128xbf16, #tpu.memory_space<vmem>>, %arg3: memref<128x128xbf16, #tpu.memory_space<vmem>>, %arg4: memref<128x128xbf16, #tpu.memory_space<vmem>>, %arg5: memref<1x128xf32, #tpu.memory_space<vmem>>, %arg6: memref<128x128xf32, #tpu.memory_space<vmem>>, %arg7: memref<128x128xf32, #tpu.memory_space<vmem>>) attributes {dimension_semantics = [#tpu.dimension_semantics<parallel>, #tpu.dimension_semantics<arbitrary>], iteration_bounds = array<i64: 1, 1>, scalar_prefetch = 0 : i64, scratch_operands = 1 : i64, tpu.core_type = #tpu.core_type<tc>, window_params = [{transform_indices = @transform_0, window_bounds = array<i64: 128, 128>}, {transform_indices = @transform_1, window_bounds = array<i64: 128, 128>}, {pipeline_mode = #tpu.pipeline_mode<synchronous>, transform_indices = @transform_2, window_bounds = array<i64: 128, 128>}, {pipeline_mode = #tpu.pipeline_mode<synchronous>, transform_indices = @transform_3, window_bounds = array<i64: 1, 128>}, {transform_indices = @transform_4, window_bounds = array<i64: 128, 128>}]} {
    %c0_i32 = arith.constant 0 : i32
    %0 = arith.cmpi eq, %arg1, %c0_i32 : i32
    %1 = arith.extui %0 : i1 to i32
    %c0_i32_0 = arith.constant 0 : i32
    %2 = arith.cmpi ne, %1, %c0_i32_0 : i32
    scf.if %2 {
      %cst_10 = arith.constant 0.000000e+00 : f32
      %12 = vector.broadcast %cst_10 : f32 to vector<128x128xf32>
      %c0_11 = arith.constant 0 : index
      %c0_12 = arith.constant 0 : index
      %13 = vector.load %arg7[%c0_11, %c0_12] : memref<128x128xf32, #tpu.memory_space<vmem>>, vector<128x128xf32>
      tpu.vector_store %arg7[%c0_11, %c0_12], %12 {strides = array<i32>} : memref<128x128xf32, #tpu.memory_space<vmem>>, vector<128x128xf32>,
    } else {
    }
    %c0 = arith.constant 0 : index
    %c0_1 = arith.constant 0 : index
    %3 = vector.load %arg7[%c0, %c0_1] : memref<128x128xf32, #tpu.memory_space<vmem>>, vector<128x128xf32>
    %c0_2 = arith.constant 0 : index
    %c0_3 = arith.constant 0 : index
    %4 = vector.load %arg2[%c0_2, %c0_3] : memref<128x128xbf16, #tpu.memory_space<vmem>>, vector<128x128xbf16>
    %c0_4 = arith.constant 0 : index
    %c0_5 = arith.constant 0 : index
    %5 = vector.load %arg3[%c0_4, %c0_5] : memref<128x128xbf16, #tpu.memory_space<vmem>>, vector<128x128xbf16>
    %cst = arith.constant dense<0.000000e+00> : vector<128x128xf32>
    %6 = tpu.matmul %4, %5, %cst {dimension_numbers = #tpu.dot_dimension_numbers<[1], [0], [0], [1], [0, 0, 1, 1], [], []>} : vector<128x128xbf16>, vector<128x128xbf16>, vector<128x128xf32> -> vector<128x128xf32>
    %7 = arith.addf %3, %6 : vector<128x128xf32>
    %c0_6 = arith.constant 0 : index
    %c0_7 = arith.constant 0 : index
    %8 = vector.load %arg7[%c0_6, %c0_7] : memref<128x128xf32, #tpu.memory_space<vmem>>, vector<128x128xf32>
    tpu.vector_store %arg7[%c0_6, %c0_7], %7 {strides = array<i32>} : memref<128x128xf32, #tpu.memory_space<vmem>>, vector<128x128xf32>,
    %c0_i32_8 = arith.constant 0 : i32
    %9 = arith.cmpi eq, %arg1, %c0_i32_8 : i32
    %10 = arith.extui %9 : i1 to i32
    %c0_i32_9 = arith.constant 0 : i32
    %11 = arith.cmpi ne, %10, %c0_i32_9 : i32
    scf.if %11 {
      %c0_10 = arith.constant 0 : index
      %c0_11 = arith.constant 0 : index
      %12 = vector.load %arg7[%c0_10, %c0_11] : memref<128x128xf32, #tpu.memory_space<vmem>>, vector<128x128xf32>
      %13 = arith.truncf %12 : vector<128x128xf32> to vector<128x128xbf16>
      %c0_12 = arith.constant 0 : index
      %c0_13 = arith.constant 0 : index
      %14 = vector.load %arg4[%c0_12, %c0_13] : memref<128x128xbf16, #tpu.memory_space<vmem>>, vector<128x128xbf16>
      %cst_14 = arith.constant dense<0.000000e+00> : vector<128x128xf32>
      %15 = tpu.matmul %13, %14, %cst_14 {dimension_numbers = #tpu.dot_dimension_numbers<[1], [0], [0], [1], [0, 0, 1, 1], [], []>} : vector<128x128xbf16>, vector<128x128xbf16>, vector<128x128xf32> -> vector<128x128xf32>
      %c0_15 = arith.constant 0 : index
      %c0_16 = arith.constant 0 : index
      %16 = vector.load %arg5[%c0_15, %c0_16] : memref<1x128xf32, #tpu.memory_space<vmem>>, vector<1x128xf32>
      %17 = vector.broadcast %16 : vector<1x128xf32> to vector<128x128xf32>
      %18 = arith.addf %15, %17 : vector<128x128xf32>
      %cst_17 = arith.constant 0.000000e+00 : f32
      %19 = vector.broadcast %cst_17 : f32 to vector<128x128xf32>
      %20 = arith.maximumf %18, %19 : vector<128x128xf32>
      %c0_18 = arith.constant 0 : index
      %c0_19 = arith.constant 0 : index
      %21 = vector.load %arg6[%c0_18, %c0_19] : memref<128x128xf32, #tpu.memory_space<vmem>>, vector<128x128xf32>
      tpu.vector_store %arg6[%c0_18, %c0_19], %20 {strides = array<i32>} : memref<128x128xf32, #tpu.memory_space<vmem>>, vector<128x128xf32>,
    } else {
    }
    return
  }
  func.func @transform_0(%arg0: i32, %arg1: i32) -> (i32, i32) {
    %c0_i32 = arith.constant 0 : i32
    return %arg0, %arg1 : i32, i32
  }
  func.func @transform_1(%arg0: i32, %arg1: i32) -> (i32, i32) {
    %c0_i32 = arith.constant 0 : i32
    %c0_i32_0 = arith.constant 0 : i32
    return %arg1, %c0_i32 : i32, i32
  }
  func.func @transform_2(%arg0: i32, %arg1: i32) -> (i32, i32) {
    %c0_i32 = arith.constant 0 : i32
    %c0_i32_0 = arith.constant 0 : i32
    %c0_i32_1 = arith.constant 0 : i32
    return %c0_i32, %c0_i32_0 : i32, i32
  }
  func.func @transform_3(%arg0: i32, %arg1: i32) -> (i32, i32) {
    %c0_i32 = arith.constant 0 : i32
    %c0_i32_0 = arith.constant 0 : i32
    %c0_i32_1 = arith.constant 0 : i32
    return %c0_i32, %c0_i32_0 : i32, i32
  }
  func.func @transform_4(%arg0: i32, %arg1: i32) -> (i32, i32) {
    %c0_i32 = arith.constant 0 : i32
    %c0_i32_0 = arith.constant 0 : i32
    return %arg0, %c0_i32 : i32, i32
  }
}

module attributes {stable_mosaic.version = 11 : i64} {
  func.func @gcn_layer_kernel(%arg0: i32, %arg1: i32, %arg2: memref<128x128xbf16, #tpu.memory_space<vmem>>, %arg3: memref<128x128xbf16, #tpu.memory_space<vmem>>, %arg4: memref<128x128xbf16, #tpu.memory_space<vmem>>, %arg5: memref<1x128xf32, #tpu.memory_space<vmem>>, %arg6: memref<128x128xbf16, #tpu.memory_space<vmem>>, %arg7: memref<128x128xf32, #tpu.memory_space<vmem>>) attributes {dimension_semantics = [#tpu.dimension_semantics<parallel>, #tpu.dimension_semantics<arbitrary>], iteration_bounds = array<i64: 1, 1>, scalar_prefetch = 0 : i64, scratch_operands = 1 : i64, tpu.core_type = #tpu.core_type<tc>, window_params = [{transform_indices = @transform_0, window_bounds = array<i64: 128, 128>}, {transform_indices = @transform_1, window_bounds = array<i64: 128, 128>}, {pipeline_mode = #tpu.pipeline_mode<synchronous>, transform_indices = @transform_2, window_bounds = array<i64: 128, 128>}, {pipeline_mode = #tpu.pipeline_mode<synchronous>, transform_indices = @transform_3, window_bounds = array<i64: 1, 128>}, {transform_indices = @transform_4, window_bounds = array<i64: 128, 128>}]} {
    %c0_i32 = arith.constant 0 : i32
    %0 = arith.cmpi eq, %arg1, %c0_i32 : i32
    %1 = arith.extui %0 : i1 to i32
    %c0_i32_0 = arith.constant 0 : i32
    %2 = arith.cmpi ne, %1, %c0_i32_0 : i32
    scf.if %2 {
      %cst_10 = arith.constant 0.000000e+00 : f32
      %12 = vector.broadcast %cst_10 : f32 to vector<128x128xf32>
      %c0_11 = arith.constant 0 : index
      %c0_12 = arith.constant 0 : index
      %13 = vector.load %arg7[%c0_11, %c0_12] : memref<128x128xf32, #tpu.memory_space<vmem>>, vector<128x128xf32>
      tpu.vector_store %arg7[%c0_11, %c0_12], %12 {strides = array<i32>} : memref<128x128xf32, #tpu.memory_space<vmem>>, vector<128x128xf32>,
    } else {
    }
    %c0 = arith.constant 0 : index
    %c0_1 = arith.constant 0 : index
    %3 = vector.load %arg7[%c0, %c0_1] : memref<128x128xf32, #tpu.memory_space<vmem>>, vector<128x128xf32>
    %c0_2 = arith.constant 0 : index
    %c0_3 = arith.constant 0 : index
    %4 = vector.load %arg2[%c0_2, %c0_3] : memref<128x128xbf16, #tpu.memory_space<vmem>>, vector<128x128xbf16>
    %c0_4 = arith.constant 0 : index
    %c0_5 = arith.constant 0 : index
    %5 = vector.load %arg3[%c0_4, %c0_5] : memref<128x128xbf16, #tpu.memory_space<vmem>>, vector<128x128xbf16>
    %cst = arith.constant dense<0.000000e+00> : vector<128x128xf32>
    %6 = tpu.matmul %4, %5, %cst {dimension_numbers = #tpu.dot_dimension_numbers<[1], [0], [0], [1], [0, 0, 1, 1], [], []>} : vector<128x128xbf16>, vector<128x128xbf16>, vector<128x128xf32> -> vector<128x128xf32>
    %7 = arith.addf %3, %6 : vector<128x128xf32>
    %c0_6 = arith.constant 0 : index
    %c0_7 = arith.constant 0 : index
    %8 = vector.load %arg7[%c0_6, %c0_7] : memref<128x128xf32, #tpu.memory_space<vmem>>, vector<128x128xf32>
    tpu.vector_store %arg7[%c0_6, %c0_7], %7 {strides = array<i32>} : memref<128x128xf32, #tpu.memory_space<vmem>>, vector<128x128xf32>,
    %c0_i32_8 = arith.constant 0 : i32
    %9 = arith.cmpi eq, %arg1, %c0_i32_8 : i32
    %10 = arith.extui %9 : i1 to i32
    %c0_i32_9 = arith.constant 0 : i32
    %11 = arith.cmpi ne, %10, %c0_i32_9 : i32
    scf.if %11 {
      %c0_10 = arith.constant 0 : index
      %c0_11 = arith.constant 0 : index
      %12 = vector.load %arg7[%c0_10, %c0_11] : memref<128x128xf32, #tpu.memory_space<vmem>>, vector<128x128xf32>
      %13 = arith.truncf %12 : vector<128x128xf32> to vector<128x128xbf16>
      %c0_12 = arith.constant 0 : index
      %c0_13 = arith.constant 0 : index
      %14 = vector.load %arg4[%c0_12, %c0_13] : memref<128x128xbf16, #tpu.memory_space<vmem>>, vector<128x128xbf16>
      %cst_14 = arith.constant dense<0.000000e+00> : vector<128x128xf32>
      %15 = tpu.matmul %13, %14, %cst_14 {dimension_numbers = #tpu.dot_dimension_numbers<[1], [0], [0], [1], [0, 0, 1, 1], [], []>} : vector<128x128xbf16>, vector<128x128xbf16>, vector<128x128xf32> -> vector<128x128xf32>
      %c0_15 = arith.constant 0 : index
      %c0_16 = arith.constant 0 : index
      %16 = vector.load %arg5[%c0_15, %c0_16] : memref<1x128xf32, #tpu.memory_space<vmem>>, vector<1x128xf32>
      %17 = vector.broadcast %16 : vector<1x128xf32> to vector<128x128xf32>
      %18 = arith.addf %15, %17 : vector<128x128xf32>
      %cst_17 = arith.constant 0.000000e+00 : f32
      %19 = vector.broadcast %cst_17 : f32 to vector<128x128xf32>
      %20 = arith.maximumf %18, %19 : vector<128x128xf32>
      %21 = arith.truncf %20 : vector<128x128xf32> to vector<128x128xbf16>
      %c0_18 = arith.constant 0 : index
      %c0_19 = arith.constant 0 : index
      %22 = vector.load %arg6[%c0_18, %c0_19] : memref<128x128xbf16, #tpu.memory_space<vmem>>, vector<128x128xbf16>
      tpu.vector_store %arg6[%c0_18, %c0_19], %21 {strides = array<i32>} : memref<128x128xbf16, #tpu.memory_space<vmem>>, vector<128x128xbf16>,
    } else {
    }
    return
  }
  func.func @transform_0(%arg0: i32, %arg1: i32) -> (i32, i32) {
    %c0_i32 = arith.constant 0 : i32
    return %arg0, %arg1 : i32, i32
  }
  func.func @transform_1(%arg0: i32, %arg1: i32) -> (i32, i32) {
    %c0_i32 = arith.constant 0 : i32
    %c0_i32_0 = arith.constant 0 : i32
    return %arg1, %c0_i32 : i32, i32
  }
  func.func @transform_2(%arg0: i32, %arg1: i32) -> (i32, i32) {
    %c0_i32 = arith.constant 0 : i32
    %c0_i32_0 = arith.constant 0 : i32
    %c0_i32_1 = arith.constant 0 : i32
    return %c0_i32, %c0_i32_0 : i32, i32
  }
  func.func @transform_3(%arg0: i32, %arg1: i32) -> (i32, i32) {
    %c0_i32 = arith.constant 0 : i32
    %c0_i32_0 = arith.constant 0 : i32
    %c0_i32_1 = arith.constant 0 : i32
    return %c0_i32, %c0_i32_0 : i32, i32
  }
  func.func @transform_4(%arg0: i32, %arg1: i32) -> (i32, i32) {
    %c0_i32 = arith.constant 0 : i32
    %c0_i32_0 = arith.constant 0 : i32
    return %arg0, %c0_i32 : i32, i32
  }
}

</mosaic_0001>

<bundles_post_ra>
// kernel: encoder_forward.3
= control target key start
LH: loop header
LB: loop body
LE: loop exit
PB: predicated region body
PF: predicated region fallthrough
CT: control target
= control target key end

     0   :  { %s842_s0 = inlined_call_operand.vmem [shape: bf16[128,128], index: 0, kind: input, shape index: {}]   ;;  %s843_s1 = inlined_call_operand.vmem [shape: bf16[128,128], index: 1, kind: input, shape index: {}]   ;;  %s844_s2 = inlined_call_operand.vmem [shape: bf16[128,128], index: 2, kind: input, shape index: {}]   ;;  %s845_s3 = inlined_call_operand.vmem [shape: f32[1,128], index: 3, kind: input, shape index: {}]   ;;  %s846_s4 = inlined_call_operand.hbm [shape: f32[128,128], index: 4, kind: output, shape index: {}]  }
   0x1   :  { %v679_v0 = vld [vmem:[%s843_s1] sm:$0xff]   ;;  %v680_v1 = vld [vmem:[%s843_s1 + $0x8] sm:$0xff]   ;;  %v681_v2 = vld [vmem:[%s843_s1 + $0x10] sm:$0xff]  }
   0x2   :  { %612 = vmatprep.subr.bf16.mxu0 %v679_v0  ;;  %v682_v3 = vld [vmem:[%s843_s1 + $0x18] sm:$0xff]   ;;  %v687_v4 = vld [vmem:[%s842_s0] sm:$0xff]   ;;  %v684_v6 = vld [vmem:[%s843_s1 + $0x28] sm:$0xff]  }
   0x3   :  { %613 = vmatpush3.bf16.msra.mxu0 %v679_v0  ;;  %628 = vmatprep.mubr.bf16.mxu0 %v687_v4  ;;  %v683_v5 = vld [vmem:[%s843_s1 + $0x20] sm:$0xff]   ;;  %v696_v8 = vld [vmem:[%s844_s2 + $0x8] sm:$0xff]   ;;  %v685_v9 = vld [vmem:[%s843_s1 + $0x30] sm:$0xff]  }
   0x4   :  { %614 = vmatprep.subr.bf16.mxu0 %v680_v1  ;;  %v695_v7 = vld [vmem:[%s844_s2] sm:$0xff]   ;;  %v697_v10 = vld [vmem:[%s844_s2 + $0x10] sm:$0xff]  }
   0x5   :  { %644 = vmatprep.subr.bf16.mxu1 %v695_v7 }
   0x6   :  { %645 = vmatpush3.bf16.msra.mxu1 %v695_v7 }
   0x7   :  { %615 = vmatpush3.bf16.msra.mxu0 %v680_v1  ;;  %646 = vmatprep.subr.bf16.mxu1 %v696_v8 }
   0x8   :  { %616 = vmatprep.subr.bf16.mxu0 %v681_v2 }
   0xa   :  { %647 = vmatpush3.bf16.msra.mxu1 %v696_v8 }
   0xb   :  { %617 = vmatpush3.bf16.msra.mxu0 %v681_v2 }
   0xc   :  { %618 = vmatprep.subr.bf16.mxu0 %v682_v3 }
   0xf   :  { %619 = vmatpush3.bf16.msra.mxu0 %v682_v3 }
  0x10   :  { %620 = vmatprep.subr.bf16.mxu0 %v683_v5 }
  0x13   :  { %621 = vmatpush3.bf16.msra.mxu0 %v683_v5 }
  0x14   :  { %622 = vmatprep.subr.bf16.mxu0 %v684_v6 }
  0x17   :  { %623 = vmatpush3.bf16.msra.mxu0 %v684_v6 }
  0x18   :  { %9 = vsyncpa [#allocation4], 0  ;;  %624 = vmatprep.subr.bf16.mxu0 %v685_v9  ;;  %v686_v11 = vld [vmem:[%s843_s1 + $0x38] sm:$0xff]   ;;  %648 = vmatprep.subr.bf16.mxu1 %v697_v10  ;;  %v699_v13 = vld [vmem:[%s844_s2 + $0x20] sm:$0xff]  }
  0x19   :  { %v698_v12 = vld [vmem:[%s844_s2 + $0x18] sm:$0xff]   ;;  %649 = vmatpush3.bf16.msra.mxu1 %v697_v10  ;;  %v688_v14 = vld [vmem:[%s842_s0 + $0x8] sm:$0xff]   ;;  %v689_v15 = vld [vmem:[%s842_s0 + $0x10] sm:$0xff]  }
  0x1a   :  { %650 = vmatprep.subr.bf16.mxu1 %v698_v12  ;;  %v700_v16 = vld [vmem:[%s844_s2 + $0x28] sm:$0xff]   ;;  %v701_v17 = vld [vmem:[%s844_s2 + $0x30] sm:$0xff]   ;;  %v690_v18 = vld [vmem:[%s842_s0 + $0x18] sm:$0xff]  }
  0x1b   :  { %625 = vmatpush3.bf16.msra.mxu0 %v685_v9  ;;  %v691_v19 = vld [vmem:[%s842_s0 + $0x20] sm:$0xff]   ;;  %v692_v20 = vld [vmem:[%s842_s0 + $0x28] sm:$0xff]   ;;  %v693_v21 = vld [vmem:[%s842_s0 + $0x30] sm:$0xff]  }
  0x1c   :  { %626 = vmatprep.subr.bf16.mxu0 %v686_v11  ;;  %v694_v22 = vld [vmem:[%s842_s0 + $0x38] sm:$0xff]   ;;  %v571_v48 = vld [vmem:[%s845_s3] ss:$0 sm:$0xff]  ;;  %s727_s3 = smov [#allocation3]  }
  0x1d   :  { %651 = vmatpush3.bf16.msra.mxu1 %v698_v12  ;;  %v702_v23 = vld [vmem:[%s844_s2 + $0x38] sm:$0xff]   ;;  %s544_s10 = sshll.u32 %s727_s3, 4  ;;  %s545_s10 = int_to_ptr.vmem [resolvable:$true] %s544_s10 }
  0x1e   :  { %652 = vmatprep.subr.bf16.mxu1 %v699_v13  ;;  %s703_s11 = scalar_lea.vmem %s545_s10, 2048  ;;  %p708_p1 = scmp.lt.s32.totalorder %s545_s10, %s545_s10 }
  0x1f   :  { %627 = vmatpush3.bf16.msra.mxu0 %v686_v11  ;;  %p704_p0 = scmp.ne.s32.totalorder %s545_s10, %s703_s11  ;;  %p709_p2 = scmp.lt.s32.totalorder %s703_s11, %s703_s11 }
  0x21   :  { %653 = vmatpush3.bf16.msra.mxu1 %v699_v13  ;;  %p710_p3 = por %p709_p2, %p708_p1 }
  0x22   :  { %629 = vmatmul.mubr.bf16.vlgmr.msra.gmra.mrb[0].mxu0 %v688_v14  ;;  %654 = vmatprep.subr.bf16.mxu1 %v700_v16 }
  0x23   :  { %632 = vmatprep.mubr.bf16.mxu0 %v689_v15  ;;  %p711_p4 = pnand %p710_p3, %p704_p0 }
  0x25   :  { %655 = vmatpush3.bf16.msra.mxu1 %v700_v16 }
  0x26   :  { %656 = vmatprep.subr.bf16.mxu1 %v701_v17 }
  0x29   :  { %657 = vmatpush3.bf16.msra.mxu1 %v701_v17 }
  0x2a   :  { %633 = vmatmul.mubr.bf16.gmra.mrb[4].mxu0 %v690_v18  ;;  %658 = vmatprep.subr.bf16.mxu1 %v702_v23 }
  0x2b   :  { %636 = vmatprep.mubr.bf16.mxu0 %v691_v19 }
  0x2d   :  { %659 = vmatpush3.bf16.msra.mxu1 %v702_v23 }
  0x32   :  { %637 = vmatmul.mubr.bf16.gmra.mrb[8].mxu0 %v692_v20 }
  0x33   :  { %640 = vmatprep.mubr.bf16.mxu0 %v693_v21 }
  0x3a   :  { %641 = vmatmul.mubr.bf16.gmra.mrb[12].mxu0 %v694_v22 }
  0xf5   :  { %v630_v24 = vpop.f32.mrb[0].mxu0 }
  0xf6   :  { %v217_v25 = vpop.f32.mrb[1].mxu0 }
  0xf7   :  { %v631_v26 = vpop.f32.mrb[2].mxu0 }
  0xf8   :  { %v332_v27 = vpack.c.bf16 %v631_v26, %v630_v24  ;;  %v220_v28 = vpop.f32.mrb[3].mxu0 }
  0xf9   :  { %v331_v29 = vpack.c.bf16 %v220_v28, %v217_v25 }
  0xfb   :  { %660 = vmatprep.mubr.bf16.mxu1 %v331_v29 }
  0xfc   :  { %661 = vmatmul.mubr.bf16.vlgmr.msra.gmra.mrb[0].mxu1 %v332_v27 }
  0xfd   :  { %v634_v30 = vpop.f32.mrb[4].mxu0 }
  0xfe   :  { %v233_v31 = vpop.f32.mrb[5].mxu0 }
  0xff   :  { %v635_v32 = vpop.f32.mrb[6].mxu0 }
 0x100   :  { %v334_v33 = vpack.c.bf16 %v635_v32, %v634_v30  ;;  %v236_v34 = vpop.f32.mrb[7].mxu0 }
 0x101   :  { %v333_v35 = vpack.c.bf16 %v236_v34, %v233_v31 }
 0x103   :  { %664 = vmatprep.mubr.bf16.mxu1 %v333_v35 }
 0x104   :  { %665 = vmatmul.mubr.bf16.gmra.mrb[4].mxu1 %v334_v33 }
 0x105   :  { %v638_v36 = vpop.f32.mrb[8].mxu0 }
 0x106   :  { %v249_v37 = vpop.f32.mrb[9].mxu0 }
 0x107   :  { %v639_v38 = vpop.f32.mrb[10].mxu0 }
 0x108   :  { %v336_v39 = vpack.c.bf16 %v639_v38, %v638_v36  ;;  %v252_v40 = vpop.f32.mrb[11].mxu0 }
 0x109   :  { %v335_v41 = vpack.c.bf16 %v252_v40, %v249_v37 }
 0x10b   :  { %668 = vmatprep.mubr.bf16.mxu1 %v335_v41 }
 0x10c   :  { %669 = vmatmul.mubr.bf16.gmra.mrb[8].mxu1 %v336_v39 }
 0x10d   :  { %v642_v42 = vpop.f32.mrb[12].mxu0 }
 0x10e   :  { %v265_v43 = vpop.f32.mrb[13].mxu0 }
 0x10f   :  { %v643_v44 = vpop.f32.mrb[14].mxu0 }
 0x110   :  { %v338_v45 = vpack.c.bf16 %v643_v44, %v642_v42  ;;  %v268_v46 = vpop.f32.mrb[15].mxu0 }
 0x111   :  { %v337_v47 = vpack.c.bf16 %v268_v46, %v265_v43 }
 0x113   :  { %672 = vmatprep.mubr.bf16.mxu1 %v337_v47 }
 0x114   :  { %673 = vmatmul.mubr.bf16.gmra.mrb[12].mxu1 %v338_v45 }
 0x1cf   :  { %v662_v49 = vpop.f32.mrb[0].mxu1 }
 0x1d0   :  { %v453_v50 = vadd.f32 %v662_v49, %v571_v48  ;;  %v444_v51 = vpop.f32.mrb[1].mxu1 }
 0x1d1   :  { %v445_v52 = vadd.f32 %v571_v48, %v444_v51  ;;  %v663_v53 = vpop.f32.mrb[2].mxu1 }
 0x1d2   :  { %v509_v54 = vmax.f32 %v453_v50, 0.0  ;;  %v456_v55 = vadd.f32 %v663_v53, %v571_v48  ;;  %v447_v56 = vpop.f32.mrb[3].mxu1 }
 0x1d3   :  { %v507_v57 = vmax.f32 %v445_v52, 0.0  ;;  %v448_v58 = vadd.f32 %v571_v48, %v447_v56 }
 0x1d4   :  { %525 = vst [vmem:[#allocation3 + $0x10] sm:$0xff] %v509_v54  ;;  %v510_v59 = vmax.f32 %v456_v55, 0.0 }
 0x1d5   :  { %523 = vst [vmem:[#allocation3] sm:$0xff] %v507_v57  ;;  %v508_v60 = vmax.f32 %v448_v58, 0.0 }
 0x1d6   :  { %526 = vst [vmem:[#allocation3 + $0x18] sm:$0xff] %v510_v59 }
 0x1d7   :  { %524 = vst [vmem:[#allocation3 + $0x8] sm:$0xff] %v508_v60  ;;  %v666_v61 = vpop.f32.mrb[4].mxu1 }
 0x1d8   :  { %v469_v62 = vadd.f32 %v666_v61, %v571_v48  ;;  %v460_v63 = vpop.f32.mrb[5].mxu1 }
 0x1d9   :  { %v461_v0 = vadd.f32 %v571_v48, %v460_v63  ;;  %v667_v1 = vpop.f32.mrb[6].mxu1 }
 0x1da   :  { %v513_v2 = vmax.f32 %v469_v62, 0.0  ;;  %v472_v3 = vadd.f32 %v667_v1, %v571_v48  ;;  %v463_v4 = vpop.f32.mrb[7].mxu1 }
 0x1db   :  { %v511_v5 = vmax.f32 %v461_v0, 0.0  ;;  %v464_v6 = vadd.f32 %v571_v48, %v463_v4 }
 0x1dc   :  { %529 = vst [vmem:[#allocation3 + $0x30] sm:$0xff] %v513_v2  ;;  %v514_v7 = vmax.f32 %v472_v3, 0.0 }
 0x1dd   :  { %527 = vst [vmem:[#allocation3 + $0x20] sm:$0xff] %v511_v5  ;;  %v512_v8 = vmax.f32 %v464_v6, 0.0 }
 0x1de   :  { %530 = vst [vmem:[#allocation3 + $0x38] sm:$0xff] %v514_v7 }
 0x1df   :  { %528 = vst [vmem:[#allocation3 + $0x28] sm:$0xff] %v512_v8  ;;  %v670_v9 = vpop.f32.mrb[8].mxu1 }
 0x1e0   :  { %v485_v10 = vadd.f32 %v670_v9, %v571_v48  ;;  %v476_v11 = vpop.f32.mrb[9].mxu1 }
 0x1e1   :  { %v477_v12 = vadd.f32 %v571_v48, %v476_v11  ;;  %v671_v13 = vpop.f32.mrb[10].mxu1 }
 0x1e2   :  { %v517_v14 = vmax.f32 %v485_v10, 0.0  ;;  %v488_v15 = vadd.f32 %v671_v13, %v571_v48  ;;  %v479_v16 = vpop.f32.mrb[11].mxu1 }
 0x1e3   :  { %v515_v17 = vmax.f32 %v477_v12, 0.0  ;;  %v480_v18 = vadd.f32 %v571_v48, %v479_v16 }
 0x1e4   :  { %533 = vst [vmem:[#allocation3 + $0x50] sm:$0xff] %v517_v14  ;;  %v518_v19 = vmax.f32 %v488_v15, 0.0 }
 0x1e5   :  { %531 = vst [vmem:[#allocation3 + $0x40] sm:$0xff] %v515_v17  ;;  %v516_v20 = vmax.f32 %v480_v18, 0.0 }
 0x1e6   :  { %534 = vst [vmem:[#allocation3 + $0x58] sm:$0xff] %v518_v19 }
 0x1e7   :  { %532 = vst [vmem:[#allocation3 + $0x48] sm:$0xff] %v516_v20  ;;  %v674_v21 = vpop.f32.mrb[12].mxu1 }
 0x1e8   :  { %v501_v22 = vadd.f32 %v674_v21, %v571_v48  ;;  %v492_v23 = vpop.f32.mrb[13].mxu1 }
 0x1e9   :  { %v493_v24 = vadd.f32 %v571_v48, %v492_v23  ;;  %v675_v25 = vpop.f32.mrb[14].mxu1 }
 0x1ea   :  { %v521_v26 = vmax.f32 %v501_v22, 0.0  ;;  %v504_v27 = vadd.f32 %v675_v25, %v571_v48  ;;  %v495_v28 = vpop.f32.mrb[15].mxu1 }
 0x1eb   :  { %v519_v29 = vmax.f32 %v493_v24, 0.0  ;;  %v496_v30 = vadd.f32 %v571_v48, %v495_v28 }
 0x1ec   :  { %537 = vst [vmem:[#allocation3 + $0x70] sm:$0xff] %v521_v26  ;;  %v522_v31 = vmax.f32 %v504_v27, 0.0 }
 0x1ed   :  { %535 = vst [vmem:[#allocation3 + $0x60] sm:$0xff] %v519_v29  ;;  %v520_v32 = vmax.f32 %v496_v30, 0.0 }
 0x1ee   :  { %538 = vst [vmem:[#allocation3 + $0x78] sm:$0xff] %v522_v31 }
 0x1ef   :  { %536 = vst [vmem:[#allocation3 + $0x68] sm:$0xff] %v520_v32 }
 0x1f0   :  { %714 = shalt.err (!%p711_p4)
}
 0x1f1   :  { %s715_s14 = scalar_lea.hbm %s846_s4, 2048 }
 0x1f2   :  { %p716_p5 = scmp.ne.s32.totalorder %s846_s4, %s715_s14  ;;  %p719_p6 = scmp.lt.u32.totalorder %s715_s14, %s846_s4 }
 0x1f4   :  { %p721_p7 = pnand %p719_p6, %p716_p5 }
 0x1f6   :  { %724 = shalt.err (!%p721_p7)
}
 0x1f7   :  { %s728_s19 = smov 128   ;;  %s729_s1 = smov 8  }
 0x1f8   :  { %550 = dma.vmem_to_hbm [thread:$0]  %s545_s10, 2048, %s846_s4, [#allocation4], %s728_s19, %s728_s19, %s729_s1  }
 0x1f9   :  { %725 = dma.done.wait [#allocation4], 2048  }
 0x1fa   :  { %726 = vsyncadd [#allocation4], 4294965248 }
 0x1fb   :  { %554 = vsyncpa [#allocation4], 1 }

// kernel: encoder_forward.2
= control target key start
LH: loop header
LB: loop body
LE: loop exit
PB: predicated region body
PF: predicated region fallthrough
CT: control target
= control target key end

     0   :  { %9 = vsyncpa [#allocation4], 0  ;;  %s1057_s0 = inlined_call_operand.hbm [shape: bf16[128,128], index: 0, kind: input, shape index: {}]   ;;  %s1058_s1 = inlined_call_operand.hbm [shape: bf16[128,128], index: 1, kind: input, shape index: {}]   ;;  %s1059_s2 = inlined_call_operand.hbm [shape: bf16[128,128], index: 2, kind: input, shape index: {}]   ;;  %s1060_s3 = inlined_call_operand.vmem [shape: f32[1,128], index: 3, kind: input, shape index: {}]   ;;  %s1061_s4 = inlined_call_operand.vmem [shape: bf16[128,128], index: 4, kind: output, shape index: {}]  }
   0x1   :  { %10 = vsyncpa [#allocation6], 0  ;;  %s948_s15 = smov [#allocation5]   ;;  %s949_s17 = smov [#allocation3]  }
   0x2   :  { %s28_s16 = sshll.u32 %s948_s15, 4  ;;  %s16_s18 = sshll.u32 %s949_s17, 4  ;;  %s29_s16 = int_to_ptr.vmem [resolvable:$true] %s28_s16  ;;  %s978_s18 = int_to_ptr.vmem [resolvable:$true] %s16_s18 }
   0x3   :  { %s878_s21 = scalar_lea.hbm %s1058_s1, 1024 }
   0x4   :  { %p879_p0 = scmp.ne.s32.totalorder %s1058_s1, %s878_s21  ;;  %p882_p1 = scmp.lt.u32.totalorder %s878_s21, %s1058_s1 }
   0x6   :  { %p884_p2 = pnand %p882_p1, %p879_p0 }
   0x8   :  { %887 = shalt.err (!%p884_p2)
}
   0x9   :  { %s888_s26 = scalar_lea.vmem %s29_s16, 1024  ;;  %p893_p4 = scmp.lt.s32.totalorder %s29_s16, %s29_s16 }
   0xa   :  { %p889_p3 = scmp.ne.s32.totalorder %s29_s16, %s888_s26  ;;  %p894_p5 = scmp.lt.s32.totalorder %s888_s26, %s888_s26 }
   0xc   :  { %p895_p6 = por %p894_p5, %p893_p4 }
   0xe   :  { %p896_p7 = pnand %p895_p6, %p889_p3 }
  0x10   :  { %899 = shalt.err (!%p896_p7)
}
  0x11   :  { %s950_s27 = smov 64   ;;  %s951_s28 = smov 4  }
  0x12   :  { %34 = dma.hbm_to_vmem [thread:$0]  %s1058_s1, 1024, %s29_s16, [#allocation6], %s950_s27, %s950_s27, %s951_s28  }
  0x13   :  { %s900_s7 = scalar_lea.hbm %s1057_s0, 1024 }
  0x14   :  { %p901_p8 = scmp.ne.s32.totalorder %s1057_s0, %s900_s7  ;;  %p904_p9 = scmp.lt.u32.totalorder %s900_s7, %s1057_s0 }
  0x16   :  { %p906_p10 = pnand %p904_p9, %p901_p8 }
  0x18   :  { %909 = shalt.err (!%p906_p10)
}
  0x19   :  { %s910_s12 = scalar_lea.vmem %s978_s18, 1024  ;;  %p915_p12 = scmp.lt.s32.totalorder %s978_s18, %s978_s18 }
  0x1a   :  { %p911_p11 = scmp.ne.s32.totalorder %s978_s18, %s910_s12  ;;  %p916_p13 = scmp.lt.s32.totalorder %s910_s12, %s910_s12 }
  0x1c   :  { %p917_p0 = por %p916_p13, %p915_p12 }
  0x1e   :  { %p918_p1 = pnand %p917_p0, %p911_p11 }
  0x20   :  { %921 = shalt.err (!%p918_p1)
}
  0x21   :  { %22 = dma.hbm_to_vmem [thread:$0]  %s1057_s0, 1024, %s978_s18, [#allocation4], %s950_s27, %s950_s27, %s951_s28  }
  0x22   :  { %s952_s14 = smov [#allocation7]   ;;  %s922_s19 = scalar_lea.hbm %s1059_s2, 1024 }
  0x23   :  { %s40_s15 = sshll.u32 %s952_s14, 4  ;;  %p923_p2 = scmp.ne.s32.totalorder %s1059_s2, %s922_s19  ;;  %s41_s15 = int_to_ptr.vmem [resolvable:$true] %s40_s15 }
  0x24   :  { %p926_p3 = scmp.lt.u32.totalorder %s922_s19, %s1059_s2 }
  0x26   :  { %p928_p4 = pnand %p926_p3, %p923_p2 }
  0x28   :  { %931 = shalt.err (!%p928_p4)
}
  0x29   :  { %s932_s24 = scalar_lea.vmem %s41_s15, 1024  ;;  %p937_p6 = scmp.lt.s32.totalorder %s41_s15, %s41_s15 }
  0x2a   :  { %p933_p5 = scmp.ne.s32.totalorder %s41_s15, %s932_s24  ;;  %p938_p7 = scmp.lt.s32.totalorder %s932_s24, %s932_s24 }
  0x2c   :  { %p939_p8 = por %p938_p7, %p937_p6 }
  0x2e   :  { %p940_p9 = pnand %p939_p8, %p933_p5 }
  0x30   :  { %943 = shalt.err (!%p940_p9)
}
  0x31   :  { %46 = dma.hbm_to_vmem [thread:$0]  %s1059_s2, 1024, %s41_s15, [#allocation6], %s950_s27, %s950_s27, %s951_s28  }
  0x32   :  { %944 = dma.done.wait [#allocation4], 1024  }
  0x33   :  { %945 = vsyncadd [#allocation4], 4294966272 }
  0x34   :  { %946 = dma.done.wait [#allocation6], 2048  }
  0x35   :  { %947 = vsyncadd [#allocation6], 4294965248  ;;  %v854_v0 = vld [vmem:[#allocation5] sm:$0xff]   ;;  %v855_v1 = vld [vmem:[#allocation5 + $0x8] sm:$0xff]  }
  0x36   :  { %785 = vmatprep.subr.bf16.mxu0 %v854_v0  ;;  %v856_v2 = vld [vmem:[#allocation5 + $0x10] sm:$0xff]   ;;  %v857_v3 = vld [vmem:[#allocation5 + $0x18] sm:$0xff]   ;;  %v862_v4 = vld [vmem:[#allocation3] sm:$0xff]  }
  0x37   :  { %786 = vmatpush3.bf16.msra.mxu0 %v854_v0  ;;  %801 = vmatprep.mubr.bf16.mxu0 %v862_v4  ;;  %v858_v5 = vld [vmem:[#allocation5 + $0x20] sm:$0xff]   ;;  %v859_v6 = vld [vmem:[#allocation5 + $0x28] sm:$0xff]   ;;  %v860_v9 = vld [vmem:[#allocation5 + $0x30] sm:$0xff]  }
  0x38   :  { %787 = vmatprep.subr.bf16.mxu0 %v855_v1  ;;  %v870_v7 = vld [vmem:[#allocation7] sm:$0xff]   ;;  %v871_v8 = vld [vmem:[#allocation7 + $0x8] sm:$0xff]   ;;  %v872_v10 = vld [vmem:[#allocation7 + $0x10] sm:$0xff]  }
  0x39   :  { %817 = vmatprep.subr.bf16.mxu1 %v870_v7  ;;  %v861_v11 = vld [vmem:[#allocation5 + $0x38] sm:$0xff]   ;;  %v874_v13 = vld [vmem:[#allocation7 + $0x20] sm:$0xff]   ;;  %v863_v14 = vld [vmem:[#allocation3 + $0x8] sm:$0xff]  }
  0x3a   :  { %818 = vmatpush3.bf16.msra.mxu1 %v870_v7  ;;  %v873_v12 = vld [vmem:[#allocation7 + $0x18] sm:$0xff]   ;;  %v864_v15 = vld [vmem:[#allocation3 + $0x10] sm:$0xff]   ;;  %v875_v16 = vld [vmem:[#allocation7 + $0x28] sm:$0xff]  }
  0x3b   :  { %788 = vmatpush3.bf16.msra.mxu0 %v855_v1  ;;  %819 = vmatprep.subr.bf16.mxu1 %v871_v8  ;;  %v876_v17 = vld [vmem:[#allocation7 + $0x30] sm:$0xff]   ;;  %v865_v18 = vld [vmem:[#allocation3 + $0x18] sm:$0xff]   ;;  %v866_v19 = vld [vmem:[#allocation3 + $0x20] sm:$0xff]  }
  0x3c   :  { %789 = vmatprep.subr.bf16.mxu0 %v856_v2  ;;  %v867_v20 = vld [vmem:[#allocation3 + $0x28] sm:$0xff]   ;;  %v868_v21 = vld [vmem:[#allocation3 + $0x30] sm:$0xff]   ;;  %v869_v22 = vld [vmem:[#allocation3 + $0x38] sm:$0xff]  }
  0x3d   :  { %v877_v23 = vld [vmem:[#allocation7 + $0x38] sm:$0xff]   ;;  %v665_v48 = vld [vmem:[%s1060_s3] ss:$0 sm:$0xff] }
  0x3e   :  { %820 = vmatpush3.bf16.msra.mxu1 %v871_v8 }
  0x3f   :  { %790 = vmatpush3.bf16.msra.mxu0 %v856_v2  ;;  %821 = vmatprep.subr.bf16.mxu1 %v872_v10 }
  0x40   :  { %791 = vmatprep.subr.bf16.mxu0 %v857_v3 }
  0x42   :  { %822 = vmatpush3.bf16.msra.mxu1 %v872_v10 }
  0x43   :  { %792 = vmatpush3.bf16.msra.mxu0 %v857_v3  ;;  %823 = vmatprep.subr.bf16.mxu1 %v873_v12 }
  0x44   :  { %793 = vmatprep.subr.bf16.mxu0 %v858_v5 }
  0x46   :  { %824 = vmatpush3.bf16.msra.mxu1 %v873_v12 }
  0x47   :  { %794 = vmatpush3.bf16.msra.mxu0 %v858_v5  ;;  %825 = vmatprep.subr.bf16.mxu1 %v874_v13 }
  0x48   :  { %795 = vmatprep.subr.bf16.mxu0 %v859_v6 }
  0x4a   :  { %826 = vmatpush3.bf16.msra.mxu1 %v874_v13 }
  0x4b   :  { %796 = vmatpush3.bf16.msra.mxu0 %v859_v6  ;;  %827 = vmatprep.subr.bf16.mxu1 %v875_v16 }
  0x4c   :  { %797 = vmatprep.subr.bf16.mxu0 %v860_v9 }
  0x4e   :  { %828 = vmatpush3.bf16.msra.mxu1 %v875_v16 }
  0x4f   :  { %798 = vmatpush3.bf16.msra.mxu0 %v860_v9  ;;  %829 = vmatprep.subr.bf16.mxu1 %v876_v17 }
  0x50   :  { %799 = vmatprep.subr.bf16.mxu0 %v861_v11 }
  0x52   :  { %830 = vmatpush3.bf16.msra.mxu1 %v876_v17 }
  0x53   :  { %800 = vmatpush3.bf16.msra.mxu0 %v861_v11  ;;  %831 = vmatprep.subr.bf16.mxu1 %v877_v23 }
  0x56   :  { %802 = vmatmul.mubr.bf16.vlgmr.msra.gmra.mrb[0].mxu0 %v863_v14  ;;  %832 = vmatpush3.bf16.msra.mxu1 %v877_v23 }
  0x57   :  { %805 = vmatprep.mubr.bf16.mxu0 %v864_v15 }
  0x5e   :  { %806 = vmatmul.mubr.bf16.gmra.mrb[4].mxu0 %v865_v18 }
  0x5f   :  { %809 = vmatprep.mubr.bf16.mxu0 %v866_v19 }
  0x66   :  { %810 = vmatmul.mubr.bf16.gmra.mrb[8].mxu0 %v867_v20 }
  0x67   :  { %813 = vmatprep.mubr.bf16.mxu0 %v868_v21 }
  0x6e   :  { %814 = vmatmul.mubr.bf16.gmra.mrb[12].mxu0 %v869_v22 }
 0x129   :  { %v803_v24 = vpop.f32.mrb[0].mxu0 }
 0x12a   :  { %v257_v25 = vpop.f32.mrb[1].mxu0 }
 0x12b   :  { %v804_v26 = vpop.f32.mrb[2].mxu0 }
 0x12c   :  { %v372_v27 = vpack.c.bf16 %v804_v26, %v803_v24  ;;  %v260_v28 = vpop.f32.mrb[3].mxu0 }
 0x12d   :  { %v371_v29 = vpack.c.bf16 %v260_v28, %v257_v25 }
 0x12f   :  { %833 = vmatprep.mubr.bf16.mxu1 %v371_v29 }
 0x130   :  { %834 = vmatmul.mubr.bf16.vlgmr.msra.gmra.mrb[0].mxu1 %v372_v27 }
 0x131   :  { %v807_v30 = vpop.f32.mrb[4].mxu0 }
 0x132   :  { %v273_v31 = vpop.f32.mrb[5].mxu0 }
 0x133   :  { %v808_v32 = vpop.f32.mrb[6].mxu0 }
 0x134   :  { %v374_v33 = vpack.c.bf16 %v808_v32, %v807_v30  ;;  %v276_v34 = vpop.f32.mrb[7].mxu0 }
 0x135   :  { %v373_v35 = vpack.c.bf16 %v276_v34, %v273_v31 }
 0x137   :  { %837 = vmatprep.mubr.bf16.mxu1 %v373_v35 }
 0x138   :  { %838 = vmatmul.mubr.bf16.gmra.mrb[4].mxu1 %v374_v33 }
 0x139   :  { %v811_v36 = vpop.f32.mrb[8].mxu0 }
 0x13a   :  { %v289_v37 = vpop.f32.mrb[9].mxu0 }
 0x13b   :  { %v812_v38 = vpop.f32.mrb[10].mxu0 }
 0x13c   :  { %v376_v39 = vpack.c.bf16 %v812_v38, %v811_v36  ;;  %v292_v40 = vpop.f32.mrb[11].mxu0 }
 0x13d   :  { %v375_v41 = vpack.c.bf16 %v292_v40, %v289_v37 }
 0x13f   :  { %841 = vmatprep.mubr.bf16.mxu1 %v375_v41 }
 0x140   :  { %842 = vmatmul.mubr.bf16.gmra.mrb[8].mxu1 %v376_v39 }
 0x141   :  { %v815_v42 = vpop.f32.mrb[12].mxu0 }
 0x142   :  { %v305_v43 = vpop.f32.mrb[13].mxu0 }
 0x143   :  { %v816_v44 = vpop.f32.mrb[14].mxu0 }
 0x144   :  { %v378_v45 = vpack.c.bf16 %v816_v44, %v815_v42  ;;  %v308_v46 = vpop.f32.mrb[15].mxu0 }
 0x145   :  { %v377_v47 = vpack.c.bf16 %v308_v46, %v305_v43 }
 0x147   :  { %845 = vmatprep.mubr.bf16.mxu1 %v377_v47 }
 0x148   :  { %846 = vmatmul.mubr.bf16.gmra.mrb[12].mxu1 %v378_v45 }
 0x203   :  { %v835_v49 = vpop.f32.mrb[0].mxu1 }
 0x204   :  { %v493_v50 = vadd.f32 %v835_v49, %v665_v48  ;;  %v484_v51 = vpop.f32.mrb[1].mxu1 }
 0x205   :  { %v485_v52 = vadd.f32 %v665_v48, %v484_v51  ;;  %v836_v53 = vpop.f32.mrb[2].mxu1 }
 0x206   :  { %v496_v54 = vadd.f32 %v836_v53, %v665_v48  ;;  %v487_v55 = vpop.f32.mrb[3].mxu1  ;;  %v549_v57 = vmax.f32 %v493_v50, 0.0 }
 0x207   :  { %v488_v56 = vadd.f32 %v665_v48, %v487_v55  ;;  %v547_v59 = vmax.f32 %v485_v52, 0.0 }
 0x208   :  { %v550_v58 = vmax.f32 %v496_v54, 0.0 }
 0x209   :  { %v548_v60 = vmax.f32 %v488_v56, 0.0 }
 0x20a   :  { %v714_v61 = vpack.c.bf16 %v550_v58, %v549_v57 }
 0x20b   :  { %v709_v62 = vpack.c.bf16 %v548_v60, %v547_v59  ;;  %v839_v63 = vpop.f32.mrb[4].mxu1 }
 0x20c   :  { %746 = vst [vmem:[%s1061_s4 + $0x8] sm:$0xff] %v714_v61   ;;  %v509_v0 = vadd.f32 %v839_v63, %v665_v48  ;;  %v500_v1 = vpop.f32.mrb[5].mxu1 }
 0x20d   :  { %710 = vst [vmem:[%s1061_s4] sm:$0xff] %v709_v62   ;;  %v501_v2 = vadd.f32 %v665_v48, %v500_v1  ;;  %v840_v3 = vpop.f32.mrb[6].mxu1 }
 0x20e   :  { %v512_v4 = vadd.f32 %v840_v3, %v665_v48  ;;  %v503_v5 = vpop.f32.mrb[7].mxu1  ;;  %v553_v7 = vmax.f32 %v509_v0, 0.0 }
 0x20f   :  { %v504_v6 = vadd.f32 %v665_v48, %v503_v5  ;;  %v551_v9 = vmax.f32 %v501_v2, 0.0 }
 0x210   :  { %v554_v8 = vmax.f32 %v512_v4, 0.0 }
 0x211   :  { %v552_v10 = vmax.f32 %v504_v6, 0.0 }
 0x212   :  { %v724_v11 = vpack.c.bf16 %v554_v8, %v553_v7 }
 0x213   :  { %v719_v12 = vpack.c.bf16 %v552_v10, %v551_v9  ;;  %v843_v13 = vpop.f32.mrb[8].mxu1 }
 0x214   :  { %748 = vst [vmem:[%s1061_s4 + $0x18] sm:$0xff] %v724_v11   ;;  %v525_v14 = vadd.f32 %v843_v13, %v665_v48  ;;  %v516_v15 = vpop.f32.mrb[9].mxu1 }
 0x215   :  { %747 = vst [vmem:[%s1061_s4 + $0x10] sm:$0xff] %v719_v12   ;;  %v517_v16 = vadd.f32 %v665_v48, %v516_v15  ;;  %v844_v17 = vpop.f32.mrb[10].mxu1 }
 0x216   :  { %v528_v18 = vadd.f32 %v844_v17, %v665_v48  ;;  %v519_v19 = vpop.f32.mrb[11].mxu1  ;;  %v557_v21 = vmax.f32 %v525_v14, 0.0 }
 0x217   :  { %v520_v20 = vadd.f32 %v665_v48, %v519_v19  ;;  %v555_v23 = vmax.f32 %v517_v16, 0.0 }
 0x218   :  { %v558_v22 = vmax.f32 %v528_v18, 0.0 }
 0x219   :  { %v556_v24 = vmax.f32 %v520_v20, 0.0 }
 0x21a   :  { %v734_v25 = vpack.c.bf16 %v558_v22, %v557_v21 }
 0x21b   :  { %v729_v26 = vpack.c.bf16 %v556_v24, %v555_v23  ;;  %v847_v27 = vpop.f32.mrb[12].mxu1 }
 0x21c   :  { %750 = vst [vmem:[%s1061_s4 + $0x28] sm:$0xff] %v734_v25   ;;  %v541_v28 = vadd.f32 %v847_v27, %v665_v48  ;;  %v532_v29 = vpop.f32.mrb[13].mxu1 }
 0x21d   :  { %749 = vst [vmem:[%s1061_s4 + $0x20] sm:$0xff] %v729_v26   ;;  %v533_v30 = vadd.f32 %v665_v48, %v532_v29  ;;  %v848_v31 = vpop.f32.mrb[14].mxu1 }
 0x21e   :  { %v544_v32 = vadd.f32 %v848_v31, %v665_v48  ;;  %v535_v33 = vpop.f32.mrb[15].mxu1  ;;  %v561_v35 = vmax.f32 %v541_v28, 0.0 }
 0x21f   :  { %v536_v34 = vadd.f32 %v665_v48, %v535_v33  ;;  %v559_v37 = vmax.f32 %v533_v30, 0.0 }
 0x220   :  { %v562_v36 = vmax.f32 %v544_v32, 0.0 }
 0x221   :  { %v560_v38 = vmax.f32 %v536_v34, 0.0 }
 0x222   :  { %v744_v39 = vpack.c.bf16 %v562_v36, %v561_v35 }
 0x223   :  { %v739_v40 = vpack.c.bf16 %v560_v38, %v559_v37 }
 0x224   :  { %752 = vst [vmem:[%s1061_s4 + $0x38] sm:$0xff] %v744_v39  }
 0x225   :  { %751 = vst [vmem:[%s1061_s4 + $0x30] sm:$0xff] %v739_v40  }
 0x226   :  { %647 = vsyncpa [#allocation4], 1 }
 0x227   :  { %648 = vsyncpa [#allocation6], 1 }

</bundles_post_ra>
